<compile_context>
chip_gen: v6e
topology: v6e:2x2x1
jax: 0.10.0
libtpu: 0.0.40
codegen_flags: <defaults>
</compile_context>

<pallas_src>
import functools

import jax
import jax.numpy as jnp
from jax import lax
from jax.experimental import pallas as pl
from jax.experimental.pallas import tpu as pltpu


def _make_kernel(s_total: int, ts: int, needs_mask: bool):
    inv_s = 1.0 / float(s_total)

    def kernel(x_ref, mean_ref, max_ref, sum_sc, max_sc):
        s_idx = pl.program_id(1)

        @pl.when(s_idx == 0)
        def _init():
            sum_sc[...] = jnp.zeros_like(sum_sc)
            max_sc[...] = jnp.full_like(max_sc, -jnp.inf)

        x = x_ref[...]  # (TB, TS, H) tile in VMEM
        if needs_mask:
            # Mask out-of-bounds sequence positions of the ragged last S tile.
            pos = s_idx * ts + lax.broadcasted_iota(jnp.int32, x.shape, 1)
            valid = pos < s_total
            x_for_sum = jnp.where(valid, x, jnp.zeros((), x.dtype))
            x_for_max = jnp.where(valid, x, jnp.full((), -jnp.inf, x.dtype))
        else:
            x_for_sum = x
            x_for_max = x

        # Accumulate in f32 (sum reduces directly into f32; max reduction is
        # exact, upcast only for the (TB, H) running-max merge).
        sum_sc[...] = sum_sc[...] + jnp.sum(x_for_sum, axis=1, dtype=jnp.float32)
        max_sc[...] = jnp.maximum(
            max_sc[...], jnp.max(x_for_max, axis=1).astype(jnp.float32))

        @pl.when(s_idx == pl.num_programs(1) - 1)
        def _finalize():
            mean_ref[...] = (sum_sc[...] * inv_s).astype(mean_ref.dtype)
            max_ref[...] = max_sc[...].astype(max_ref.dtype)

    return kernel


def _choose_tiles(B, S, H, itemsize):
    # Batch tile: full batch when small, else 8 rows (multiple of 8 sublanes).
    TB = B if B <= 8 else 8
    # Sequence tile: target ~4 MiB per input buffer (double-buffered ~8 MiB),
    # rounded to a multiple of 8 (sublane alignment for the second-to-last dim).
    target_bytes = 4 * 1024 * 1024
    ts = target_bytes // max(1, TB * H * itemsize)
    ts = (ts // 8) * 8
    if ts >= S or ts < 8:
        TS = S           # full sequence fits in one tile (or S < 8)
    else:
        TS = ts
    return TB, TS


@functools.partial(jax.jit, static_argnames=("block_s",))
def mean_max_pooling(last_hidden_state, attention_mask=None, *, block_s=None):
    """Pallas TPU implementation of MeanMaxPooling.forward.

    attention_mask is intentionally ignored (matches the PyTorch module).
    Returns (B, 2*H): [mean over seq | max over seq].
    """
    del attention_mask
    B, S, H = last_hidden_state.shape
    dtype = last_hidden_state.dtype
    itemsize = jnp.dtype(dtype).itemsize

    TB, TS = _choose_tiles(B, S, H, itemsize)
    if block_s is not None:
        TS = min(block_s, S)
    grid = (pl.cdiv(B, TB), pl.cdiv(S, TS))
    needs_mask = (S % TS) != 0

    kernel = _make_kernel(S, TS, needs_mask)

    cost = pl.CostEstimate(
        flops=2 * B * S * H,
        transcendentals=0,
        bytes_accessed=B * S * H * itemsize + 2 * B * H * itemsize,
    )

    mean_out, max_out = pl.pallas_call(
        kernel,
        out_shape=(
            jax.ShapeDtypeStruct((B, H), dtype),
            jax.ShapeDtypeStruct((B, H), dtype),
        ),
        grid_spec=pltpu.PrefetchScalarGridSpec(
            num_scalar_prefetch=0,
            grid=grid,
            in_specs=[pl.BlockSpec((TB, TS, H), lambda b, s: (b, s, 0))],
            out_specs=[
                pl.BlockSpec((TB, H), lambda b, s: (b, 0)),
                pl.BlockSpec((TB, H), lambda b, s: (b, 0)),
            ],
            scratch_shapes=[
                pltpu.VMEM((TB, H), jnp.float32),  # running sum
                pltpu.VMEM((TB, H), jnp.float32),  # running max
            ],
        ),
        compiler_params=pltpu.CompilerParams(
            dimension_semantics=("parallel", "arbitrary"),
        ),
        cost_estimate=cost,
    )(last_hidden_state)

    # Lane-dense stores inside the kernel; the concat is cheap layout plumbing.
    return jnp.concatenate([mean_out, max_out], axis=1)


def _reference(last_hidden_state):
    mean_pool = jnp.mean(last_hidden_state.astype(jnp.float32), axis=1)
    max_pool = jnp.max(last_hidden_state.astype(jnp.float32), axis=1)
    return jnp.concatenate([mean_pool, max_pool], axis=1).astype(
        last_hidden_state.dtype)


if __name__ == "__main__":
    key = jax.random.PRNGKey(0)
    k1, k2 = jax.random.split(key)

    # Test 1: small shape matching the module's intent (batch, seq, hidden).
    B, S, H = 2, 8, 32
    last_hidden_state = jax.random.normal(k1, (B, S, H), dtype=jnp.float32)
    attention_mask = jnp.ones((B, S), dtype=jnp.int32)  # unused, as in PyTorch

    out = mean_max_pooling(last_hidden_state, attention_mask)
    out = jax.block_until_ready(out)
    ref = _reference(last_hidden_state)
    assert out.shape == (B, 2 * H), out.shape
    assert jnp.allclose(out, ref, atol=1e-5, rtol=1e-5), "mismatch (test 1)"

    # Test 2: exercise the tiled/ragged reduction path (S not divisible by TS).
    B2, S2, H2 = 4, 20, 128
    x2 = jax.random.normal(k2, (B2, S2, H2), dtype=jnp.float32)
    out2 = jax.block_until_ready(mean_max_pooling(x2, block_s=8))
    ref2 = _reference(x2)
    assert out2.shape == (B2, 2 * H2), out2.shape
    assert jnp.allclose(out2, ref2, atol=1e-5, rtol=1e-5), "mismatch (test 2)"

    print("KERNEL_OK")
</pallas_src>

<mosaic_0001>
module attributes {stable_mosaic.version = 11 : i64} {
  func.func @kernel(%arg0: i32, %arg1: i32, %arg2: memref<2x8x32xf32, #tpu.memory_space<vmem>>, %arg3: memref<2x32xf32, #tpu.memory_space<vmem>>, %arg4: memref<2x32xf32, #tpu.memory_space<vmem>>, %arg5: memref<2x32xf32, #tpu.memory_space<vmem>>, %arg6: memref<2x32xf32, #tpu.memory_space<vmem>>) attributes {dimension_semantics = [#tpu.dimension_semantics<parallel>, #tpu.dimension_semantics<arbitrary>], iteration_bounds = array<i64: 1, 1>, scalar_prefetch = 0 : i64, scratch_operands = 2 : i64, tpu.core_type = #tpu.core_type<tc>, window_params = [{transform_indices = @transform_0, window_bounds = array<i64: 2, 8, 32>}, {transform_indices = @transform_1, window_bounds = array<i64: 2, 32>}, {transform_indices = @transform_2, window_bounds = array<i64: 2, 32>}]} {
    %c0_i32 = arith.constant 0 : i32
    %0 = arith.cmpi eq, %arg1, %c0_i32 : i32
    %1 = arith.extui %0 : i1 to i32
    %c0_i32_0 = arith.constant 0 : i32
    %2 = arith.cmpi ne, %1, %c0_i32_0 : i32
    scf.if %2 {
      %cst_14 = arith.constant 0.000000e+00 : f32
      %15 = vector.broadcast %cst_14 : f32 to vector<2x32xf32>
      %c0_15 = arith.constant 0 : index
      %c0_16 = arith.constant 0 : index
      %16 = vector.load %arg5[%c0_15, %c0_16] : memref<2x32xf32, #tpu.memory_space<vmem>>, vector<2x32xf32>
      tpu.vector_store %arg5[%c0_15, %c0_16], %15 {strides = array<i32>} : memref<2x32xf32, #tpu.memory_space<vmem>>, vector<2x32xf32>,
      %cst_17 = arith.constant 0xFF800000 : f32
      %17 = vector.broadcast %cst_17 : f32 to vector<2x32xf32>
      %c0_18 = arith.constant 0 : index
      %c0_19 = arith.constant 0 : index
      %18 = vector.load %arg6[%c0_18, %c0_19] : memref<2x32xf32, #tpu.memory_space<vmem>>, vector<2x32xf32>
      tpu.vector_store %arg6[%c0_18, %c0_19], %17 {strides = array<i32>} : memref<2x32xf32, #tpu.memory_space<vmem>>, vector<2x32xf32>,
    } else {
    }
    %c0 = arith.constant 0 : index
    %c0_1 = arith.constant 0 : index
    %c0_2 = arith.constant 0 : index
    %3 = vector.load %arg2[%c0, %c0_1, %c0_2] : memref<2x8x32xf32, #tpu.memory_space<vmem>>, vector<2x8x32xf32>
    %c0_3 = arith.constant 0 : index
    %c0_4 = arith.constant 0 : index
    %4 = vector.load %arg5[%c0_3, %c0_4] : memref<2x32xf32, #tpu.memory_space<vmem>>, vector<2x32xf32>
    %cst = arith.constant dense<0.000000e+00> : vector<2x32xf32>
    %5 = vector.multi_reduction <add>, %3, %cst [1] : vector<2x8x32xf32> to vector<2x32xf32>
    %6 = arith.addf %4, %5 : vector<2x32xf32>
    %c0_5 = arith.constant 0 : index
    %c0_6 = arith.constant 0 : index
    %7 = vector.load %arg5[%c0_5, %c0_6] : memref<2x32xf32, #tpu.memory_space<vmem>>, vector<2x32xf32>
    tpu.vector_store %arg5[%c0_5, %c0_6], %6 {strides = array<i32>} : memref<2x32xf32, #tpu.memory_space<vmem>>, vector<2x32xf32>,
    %c0_7 = arith.constant 0 : index
    %c0_8 = arith.constant 0 : index
    %8 = vector.load %arg6[%c0_7, %c0_8] : memref<2x32xf32, #tpu.memory_space<vmem>>, vector<2x32xf32>
    %cst_9 = arith.constant dense<0xFF800000> : vector<2x32xf32>
    %9 = vector.multi_reduction <maximumf>, %3, %cst_9 [1] : vector<2x8x32xf32> to vector<2x32xf32>
    %10 = arith.maximumf %8, %9 : vector<2x32xf32>
    %c0_10 = arith.constant 0 : index
    %c0_11 = arith.constant 0 : index
    %11 = vector.load %arg6[%c0_10, %c0_11] : memref<2x32xf32, #tpu.memory_space<vmem>>, vector<2x32xf32>
    tpu.vector_store %arg6[%c0_10, %c0_11], %10 {strides = array<i32>} : memref<2x32xf32, #tpu.memory_space<vmem>>, vector<2x32xf32>,
    %c0_i32_12 = arith.constant 0 : i32
    %12 = arith.cmpi eq, %arg1, %c0_i32_12 : i32
    %13 = arith.extui %12 : i1 to i32
    %c0_i32_13 = arith.constant 0 : i32
    %14 = arith.cmpi ne, %13, %c0_i32_13 : i32
    scf.if %14 {
      %c0_14 = arith.constant 0 : index
      %c0_15 = arith.constant 0 : index
      %15 = vector.load %arg5[%c0_14, %c0_15] : memref<2x32xf32, #tpu.memory_space<vmem>>, vector<2x32xf32>
      %cst_16 = arith.constant 1.250000e-01 : f32
      %16 = vector.broadcast %cst_16 : f32 to vector<2x32xf32>
      %17 = arith.mulf %15, %16 : vector<2x32xf32>
      %c0_17 = arith.constant 0 : index
      %c0_18 = arith.constant 0 : index
      %18 = vector.load %arg3[%c0_17, %c0_18] : memref<2x32xf32, #tpu.memory_space<vmem>>, vector<2x32xf32>
      tpu.vector_store %arg3[%c0_17, %c0_18], %17 {strides = array<i32>} : memref<2x32xf32, #tpu.memory_space<vmem>>, vector<2x32xf32>,
      %c0_19 = arith.constant 0 : index
      %c0_20 = arith.constant 0 : index
      %19 = vector.load %arg6[%c0_19, %c0_20] : memref<2x32xf32, #tpu.memory_space<vmem>>, vector<2x32xf32>
      %c0_21 = arith.constant 0 : index
      %c0_22 = arith.constant 0 : index
      %20 = vector.load %arg4[%c0_21, %c0_22] : memref<2x32xf32, #tpu.memory_space<vmem>>, vector<2x32xf32>
      tpu.vector_store %arg4[%c0_21, %c0_22], %19 {strides = array<i32>} : memref<2x32xf32, #tpu.memory_space<vmem>>, vector<2x32xf32>,
    } else {
    }
    return
  }
  func.func @transform_0(%arg0: i32, %arg1: i32) -> (i32, i32, i32) {
    %c0_i32 = arith.constant 0 : i32
    %c0_i32_0 = arith.constant 0 : i32
    return %arg0, %arg1, %c0_i32 : i32, i32, i32
  }
  func.func @transform_1(%arg0: i32, %arg1: i32) -> (i32, i32) {
    %c0_i32 = arith.constant 0 : i32
    %c0_i32_0 = arith.constant 0 : i32
    return %arg0, %c0_i32 : i32, i32
  }
  func.func @transform_2(%arg0: i32, %arg1: i32) -> (i32, i32) {
    %c0_i32 = arith.constant 0 : i32
    %c0_i32_0 = arith.constant 0 : i32
    return %arg0, %c0_i32 : i32, i32
  }
}

</mosaic_0001>

<bundles_post_ra>
// kernel: mean_max_pooling.1
= control target key start
LH: loop header
LB: loop body
LE: loop exit
PB: predicated region body
PF: predicated region fallthrough
CT: control target
= control target key end

     0   :  { %8 = vsyncpa [#allocation5], 0  ;;  %s122_s9 = smov [#allocation4]   ;;  %s157_s0 = inlined_call_operand.hbm [shape: f32[2,8,32], index: 0, kind: input, shape index: {}]   ;;  %s158_s1 = inlined_call_operand.vmem [shape: f32[2,32], index: 1, kind: output, shape index: {0}]   ;;  %s159_s2 = inlined_call_operand.vmem [shape: f32[2,32], index: 2, kind: output, shape index: {1}]  }
   0x1   :  { %s14_s10 = sshll.u32 %s122_s9, 4  ;;  %s15_s10 = int_to_ptr.vmem [resolvable:$true] %s14_s10 }
   0x2   :  { %s108_s11 = scalar_lea.vmem %s15_s10, 256  ;;  %p113_p1 = scmp.lt.s32.totalorder %s15_s10, %s15_s10 }
   0x3   :  { %p109_p0 = scmp.ne.s32.totalorder %s15_s10, %s108_s11  ;;  %p114_p2 = scmp.lt.s32.totalorder %s108_s11, %s108_s11 }
   0x5   :  { %p115_p3 = por %p114_p2, %p113_p1 }
   0x7   :  { %p116_p4 = pnand %p115_p3, %p109_p0 }
   0x9   :  { %119 = shalt.err (!%p116_p4)
}
   0xa   :  { %s123_s12 = smov 128   ;;  %s124_s13 = smov 8  }
   0xb   :  { %20 = dma.hbm_to_vmem [thread:$0]  %s157_s0, 256, %s15_s10, [#allocation5], %s123_s12, %s123_s12, %s124_s13  }
   0xc   :  { %120 = dma.done.wait [#allocation5], 256  }
   0xd   :  { %121 = vsyncadd [#allocation5], 4294967040  ;;  %vm28_vm0 = vcmask 254976   ;;  %v125_v0 = vmov 0.0   ;;  %v126_v1 = vmov -inf   ;;  %vm34_vm1 = vcmask 261120  }
   0xe   :  { %29 = vst.msk [vmem:[#allocation2] sm:$0x3] %vm28_vm0, %v125_v0  ;;  %30 = vst.msk [vmem:[#allocation3] sm:$0x3] %vm28_vm0, %v126_v1  ;;  %v31_v2 = vld [vmem:[#allocation4] sm:$0xff]  ;;  %v32_v3 = vld [vmem:[#allocation4 + $0x8] sm:$0xff] }
   0xf   :  { %v35_v4 = vsel %vm34_vm1, %v31_v2, 0.0  ;;  %v42_v5 = vsel %vm34_vm1, %v32_v3, 0.0  ;;  %v58_v8 = vsel %vm34_vm1, %v31_v2, -inf  ;;  %v65_v9 = vsel %vm34_vm1, %v32_v3, -inf }
  0x10   :  { %v36_v6 = vrot.slane %v35_v4, 4  ;;  %v43_v7 = vrot.slane %v42_v5, 4  ;;  %v59_v10 = vrot.slane %v58_v8, 4  ;;  %v66_v11 = vrot.slane %v65_v9, 4 }
  0x11   :  { %vm51_vm2 = vcmask 1041409  }
  0x12   :  { %v37_v12 = vadd.f32 %v36_v6, %v35_v4  ;;  %v44_v13 = vadd.f32 %v43_v7, %v42_v5  ;;  %v60_v14 = vmax.f32 %v58_v8, %v59_v10  ;;  %v67_v15 = vmax.f32 %v65_v9, %v66_v11 }
  0x14   :  { %v38_v16 = vrot.slane %v37_v12, 2  ;;  %v45_v17 = vrot.slane %v44_v13, 2  ;;  %v61_v18 = vrot.slane %v60_v14, 2  ;;  %v68_v19 = vrot.slane %v67_v15, 2 }
  0x15   :  { %v33_v28 = vld [vmem:[#allocation2] sm:$0x3]  ;;  %v57_v31 = vld [vmem:[#allocation3] sm:$0x3] }
  0x16   :  { %v39_v20 = vadd.f32 %v38_v16, %v37_v12  ;;  %v46_v21 = vadd.f32 %v45_v17, %v44_v13  ;;  %v62_v22 = vmax.f32 %v60_v14, %v61_v18  ;;  %v69_v23 = vmax.f32 %v67_v15, %v68_v19 }
  0x18   :  { %v40_v24 = vrot.slane %v39_v20, 1  ;;  %v47_v25 = vrot.slane %v46_v21, 1  ;;  %v63_v26 = vrot.slane %v62_v22, 1  ;;  %v70_v27 = vrot.slane %v69_v23, 1 }
  0x1a   :  { %v41_v29 = vadd.f32 %v40_v24, %v39_v20  ;;  %v48_v30 = vadd.f32 %v47_v25, %v46_v21  ;;  %v64_v32 = vmax.f32 %v62_v22, %v63_v26  ;;  %v71_v33 = vmax.f32 %v69_v23, %v70_v27 }
  0x1c   :  { %v52_v34 = vsel %vm51_vm2, %v48_v30, %v41_v29  ;;  %v74_v36 = vsel %vm51_vm2, %v71_v33, %v64_v32 }
  0x1d   :  { %v54_v35 = vadd.f32 %v52_v34, %v33_v28  ;;  %v76_v37 = vmax.f32 %v57_v31, %v74_v36 }
  0x1f   :  { %56 = vst.msk [vmem:[#allocation2] sm:$0x3] %vm28_vm0, %v54_v35  ;;  %77 = vst.msk [vmem:[#allocation3] sm:$0x3] %vm28_vm0, %v76_v37 }
  0x26   :  { %v81_v38 = vld [vmem:[#allocation2] sm:$0x3]  ;;  %v84_v40 = vld [vmem:[#allocation3] sm:$0x3] }
  0x27   :  { %v82_v39 = vmul.f32 0.125, %v81_v38  ;;  %85 = vst.msk [vmem:[%s159_s2] sm:$0x3] %vm28_vm0, %v84_v40 }
  0x29   :  { %83 = vst.msk [vmem:[%s158_s1] sm:$0x3] %vm28_vm0, %v82_v39 }
  0x2a   :  { %94 = vsyncpa [#allocation5], 1 }

</bundles_post_ra>
